<compile_context>
chip_gen: v6e
topology: v6e:2x2x1
jax: 0.10.0
libtpu: 0.0.40
codegen_flags: <defaults>
</compile_context>

<pallas_src>
import functools

import jax
import jax.numpy as jnp
from jax.experimental import pallas as pl
from jax.experimental.pallas import tpu as pltpu


_TARGET_BLOCK_BYTES = 6 * 1024 * 1024   # per-input DMA block (review: 4-8 MiB)
_MIN_GRID_BLOCKS = 8                    # >=4 steps per TC on v7x, pipeline depth elsewhere
_VMEM_LIMIT_BYTES = 48 * 1024 * 1024    # fits v7x 64 MiB physical; ample on v5e/v6e
_CHUNK_ELEMS = 64 * 1024                # ~1 MiB of live f32 temporaries per chunk
_MAX_STATIC_CHUNKS = 32                 # bound unrolled chunk count (code size)


def _corr_loss_kernel(pred_ref, target_ref, out_ref, *, l_chunk, seq_len):
    """Per-row Pearson correlation of a (TN, L) block; writes -corr to (TN, 1)."""
    tn = out_ref.shape[0]
    L = seq_len
    # Static chunk boundaries along the lane axis: live f32 temporaries are one
    # (tn, l_chunk) chunk regardless of how big the streamed DMA block is.
    starts = list(range(0, L, l_chunk))

    def load(s):
        e = min(s + l_chunk, L)
        p = pred_ref[:, s:e].astype(jnp.float32)
        t = target_ref[:, s:e].astype(jnp.float32)
        return p, t

    # ---- pass 1: per-row sums -> means --------------------------------------
    # Two-pass centered math preserves 1e-5 f32 agreement with the reference
    # (single-pass raw moments risk catastrophic cancellation for large means).
    sp = jnp.zeros((tn, 1), jnp.float32)
    st = jnp.zeros((tn, 1), jnp.float32)
    for s in starts:
        p, t = load(s)
        sp = sp + jnp.sum(p, axis=1, keepdims=True)
        st = st + jnp.sum(t, axis=1, keepdims=True)
    mean_p = sp * (1.0 / L)
    mean_t = st * (1.0 / L)

    # ---- pass 2: centered cross / auto sums ----------------------------------
    # The 1/(L-1) unbiased-covariance factors cancel in the correlation.
    s_pt = jnp.zeros((tn, 1), jnp.float32)
    s_pp = jnp.zeros((tn, 1), jnp.float32)
    s_tt = jnp.zeros((tn, 1), jnp.float32)
    for s in starts:
        p, t = load(s)
        dp = p - mean_p
        dt = t - mean_t
        s_pt = s_pt + jnp.sum(dp * dt, axis=1, keepdims=True)
        s_pp = s_pp + jnp.sum(dp * dp, axis=1, keepdims=True)
        s_tt = s_tt + jnp.sum(dt * dt, axis=1, keepdims=True)

    corr = s_pt / jnp.sqrt(s_pp * s_tt)
    out_ref[...] = (-corr).astype(out_ref.dtype)


def _row_align(itemsize):
    # Min sublane tile: f32 -> 8 rows, bf16 -> 16, int8/fp8 -> 32.
    return max(8, 32 // max(1, itemsize))


def _choose_row_tile(N, L, itemsize):
    """Row tile sized by block bytes (~6 MiB/input), >= _MIN_GRID_BLOCKS steps."""
    align = _row_align(itemsize)
    tn = max(align, _TARGET_BLOCK_BYTES // max(1, L * itemsize))
    # Keep several grid steps when the batch is big enough so the "parallel"
    # axis feeds both v7x TensorCores and the software pipeline has depth.
    cap = pl.cdiv(N, _MIN_GRID_BLOCKS)
    if cap >= align:
        tn = min(tn, cap)
    if tn >= N:
        return N
    # Prefer 32-row alignment (covers f32/bf16/int8 uniformly); fall back to
    # the dtype minimum when the byte budget forces a narrower tile.
    a = 32 if tn >= 32 else align
    tn = max(a, (tn // a) * a)
    return min(tn, N)


def _choose_l_chunk(tn, L):
    """Lane-chunk width keeping per-chunk f32 temporaries to ~1 MiB."""
    if tn * L <= _CHUNK_ELEMS:
        return L
    lc = max(128, ((_CHUNK_ELEMS // tn) // 128) * 128)
    # Bound the number of statically-unrolled chunks.
    min_lc = -(-L // _MAX_STATIC_CHUNKS)        # ceil(L / max_chunks)
    min_lc = -(-min_lc // 128) * 128            # round up to lane multiple
    lc = max(lc, min_lc)
    return min(lc, L)


def corr_loss_pallas(pred, target, loss_weight=1.0, row_tile=None, l_chunk=None):
    """loss_weight * (-pearson_corr(pred, target)) per row.

    pred, target: (N, L) arrays (any float dtype; streamed natively, reduced
                  in float32).
    Returns: (N,) float32 loss vector.
    """
    assert pred.shape == target.shape and pred.ndim == 2
    N, L = pred.shape
    itemsize = jnp.dtype(pred.dtype).itemsize

    if row_tile is not None:
        tn = min(int(row_tile), N)
        if tn < N:
            a = _row_align(itemsize)
            tn = max(a, (tn // a) * a)
    else:
        tn = _choose_row_tile(N, L, itemsize)
    num_blocks = pl.cdiv(N, tn)

    if l_chunk is not None:
        lc = max(1, min(int(l_chunk), L))
    else:
        lc = _choose_l_chunk(tn, L)

    kernel = functools.partial(_corr_loss_kernel, l_chunk=lc, seq_len=L)

    # Advisory cost hint: purely HBM-bound streaming of both inputs.
    bytes_accessed = (N * L * itemsize
                      + N * L * jnp.dtype(target.dtype).itemsize
                      + N * 4)
    cost = pl.CostEstimate(
        flops=10 * N * L, transcendentals=N, bytes_accessed=bytes_accessed)

    out = pl.pallas_call(
        kernel,
        out_shape=jax.ShapeDtypeStruct((N, 1), jnp.float32),
        grid_spec=pltpu.PrefetchScalarGridSpec(
            num_scalar_prefetch=0,
            grid=(num_blocks,),
            in_specs=[
                pl.BlockSpec((tn, L), lambda i: (i, 0)),
                pl.BlockSpec((tn, L), lambda i: (i, 0)),
            ],
            out_specs=pl.BlockSpec((tn, 1), lambda i: (i, 0)),
        ),
        compiler_params=pltpu.CompilerParams(
            dimension_semantics=("parallel",),
            vmem_limit_bytes=_VMEM_LIMIT_BYTES,
        ),
        cost_estimate=cost,
    )(pred, target)

    neg_corr = out[:, 0]
    # Weight applied outside the kernel: the pallas_call is weight-agnostic, so
    # varying loss_weight never retraces/recompiles the kernel.
    return loss_weight * neg_corr


class CorrLoss:
    """JAX/Pallas equivalent of mmhuman3d CorrLoss (forward only)."""

    def __init__(self, loss_weight=1.0):
        self.loss_weight = loss_weight

    def __call__(self, pred, target, weight=None, avg_factor=None,
                 loss_weight_override=None):
        # Note: the reference PyTorch forward also ignores `weight` and
        # `avg_factor`; parity is intentional.
        lw = (loss_weight_override
              if loss_weight_override is not None else self.loss_weight)
        return corr_loss_pallas(pred, target, loss_weight=lw)


def _reference(pred, target, loss_weight=1.0):
    """Pure-JAX reference mirroring the PyTorch code path exactly."""
    N, L = pred.shape
    pts = jnp.concatenate([pred[:, :, None], target[:, :, None]], axis=2)  # (N, L, 2)
    mean = jnp.mean(pts, axis=1, keepdims=True)
    diffs = pts - mean                                                     # (N, L, 2)
    prods = jnp.einsum("nld,nle->nlde", diffs, diffs)                      # (N, L, 2, 2)
    bcov = jnp.sum(prods, axis=1) / (L - 1)                                # (N, 2, 2)
    std_p = jnp.std(pred, axis=1, ddof=1)
    std_t = jnp.std(target, axis=1, ddof=1)
    corr = bcov[:, 0, 1] / (std_p * std_t)
    return loss_weight * (-corr)


if __name__ == "__main__":
    key = jax.random.PRNGKey(0)

    # --- 1) small base case: single block, single chunk ---------------------
    k1, k2 = jax.random.split(key)
    N, L = 4, 64
    pred = jax.random.normal(k1, (N, L), dtype=jnp.float32)
    target = 0.5 * pred + jax.random.normal(k2, (N, L), dtype=jnp.float32)

    loss_mod = CorrLoss(loss_weight=1.0)
    loss = jax.block_until_ready(loss_mod(pred, target))
    ref = _reference(pred, target, loss_weight=1.0)
    assert loss.shape == (N,)
    assert jnp.allclose(loss, ref, atol=1e-5, rtol=1e-5), (loss, ref)

    # --- 2) multi-row-block (grid over N), nonzero target mean --------------
    k3, k4 = jax.random.split(k2)
    N2, L2 = 32, 256
    pred2 = jax.random.normal(k3, (N2, L2), dtype=jnp.float32)
    target2 = 0.3 * pred2 + jax.random.normal(k4, (N2, L2), dtype=jnp.float32) + 1.5
    loss2 = jax.block_until_ready(
        corr_loss_pallas(pred2, target2, loss_weight=2.0, row_tile=8))
    ref2 = _reference(pred2, target2, loss_weight=2.0)
    assert loss2.shape == (N2,)
    assert jnp.allclose(loss2, ref2, atol=1e-5, rtol=1e-5), (loss2, ref2)

    # --- 3a) chunked lane reduction with a remainder chunk (128,128,64) -----
    k5, k6 = jax.random.split(k4)
    N3, L3 = 16, 320
    pred3 = jax.random.normal(k5, (N3, L3), dtype=jnp.float32)
    target3 = -0.4 * pred3 + jax.random.normal(k6, (N3, L3), dtype=jnp.float32)
    loss3 = jax.block_until_ready(corr_loss_pallas(pred3, target3, l_chunk=128))
    ref3 = _reference(pred3, target3)
    assert jnp.allclose(loss3, ref3, atol=1e-5, rtol=1e-5), (loss3, ref3)

    # --- 3b) many chunks (10 x 128 lanes) ------------------------------------
    k7, k8 = jax.random.split(k6)
    N4, L4 = 16, 1280
    pred4 = jax.random.normal(k7, (N4, L4), dtype=jnp.float32)
    target4 = 0.2 * pred4 + jax.random.normal(k8, (N4, L4), dtype=jnp.float32)
    loss4 = jax.block_until_ready(corr_loss_pallas(pred4, target4, l_chunk=128))
    ref4 = _reference(pred4, target4)
    assert jnp.allclose(loss4, ref4, atol=1e-5, rtol=1e-5), (loss4, ref4)

    # --- 4) native bf16 streaming (halves HBM traffic; f32 accumulation) ----
    pred_bf = pred2.astype(jnp.bfloat16)
    target_bf = target2.astype(jnp.bfloat16)
    loss_bf = jax.block_until_ready(corr_loss_pallas(pred_bf, target_bf))
    ref_bf = _reference(pred_bf.astype(jnp.float32),
                        target_bf.astype(jnp.float32))
    assert jnp.allclose(loss_bf, ref_bf, atol=1e-3, rtol=1e-3), (loss_bf, ref_bf)

    print("KERNEL_OK")
</pallas_src>

<mosaic_0001>
module attributes {stable_mosaic.version = 11 : i64} {
  func.func @_corr_loss_kernel(%arg0: i32, %arg1: memref<4x64xf32, #tpu.memory_space<vmem>>, %arg2: memref<4x64xf32, #tpu.memory_space<vmem>>, %arg3: memref<4x1xf32, #tpu.memory_space<vmem>>) attributes {dimension_semantics = [#tpu.dimension_semantics<parallel>], iteration_bounds = array<i64: 1>, scalar_prefetch = 0 : i64, scratch_operands = 0 : i64, tpu.core_type = #tpu.core_type<tc>, window_params = [{transform_indices = @transform_0, window_bounds = array<i64: 4, 64>}, {transform_indices = @transform_1, window_bounds = array<i64: 4, 64>}, {transform_indices = @transform_2, window_bounds = array<i64: 4, 1>}]} {
    %cst = arith.constant 0.000000e+00 : f32
    %0 = vector.broadcast %cst : f32 to vector<4x1xf32>
    %cst_0 = arith.constant 0.000000e+00 : f32
    %1 = vector.broadcast %cst_0 : f32 to vector<4x1xf32>
    %c0 = arith.constant 0 : index
    %c0_1 = arith.constant 0 : index
    %2 = vector.load %arg1[%c0, %c0_1] : memref<4x64xf32, #tpu.memory_space<vmem>>, vector<4x64xf32>
    %c0_2 = arith.constant 0 : index
    %c0_3 = arith.constant 0 : index
    %3 = vector.load %arg2[%c0_2, %c0_3] : memref<4x64xf32, #tpu.memory_space<vmem>>, vector<4x64xf32>
    %cst_4 = arith.constant dense<0.000000e+00> : vector<4xf32>
    %4 = vector.multi_reduction <add>, %2, %cst_4 [1] : vector<4x64xf32> to vector<4xf32>
    %5 = vector.shape_cast %4 : vector<4xf32> to vector<4x1xf32>
    %6 = arith.addf %0, %5 : vector<4x1xf32>
    %cst_5 = arith.constant dense<0.000000e+00> : vector<4xf32>
    %7 = vector.multi_reduction <add>, %3, %cst_5 [1] : vector<4x64xf32> to vector<4xf32>
    %8 = vector.shape_cast %7 : vector<4xf32> to vector<4x1xf32>
    %9 = arith.addf %1, %8 : vector<4x1xf32>
    %cst_6 = arith.constant 1.562500e-02 : f32
    %10 = vector.broadcast %cst_6 : f32 to vector<4x1xf32>
    %11 = arith.mulf %6, %10 : vector<4x1xf32>
    %cst_7 = arith.constant 1.562500e-02 : f32
    %12 = vector.broadcast %cst_7 : f32 to vector<4x1xf32>
    %13 = arith.mulf %9, %12 : vector<4x1xf32>
    %cst_8 = arith.constant 0.000000e+00 : f32
    %14 = vector.broadcast %cst_8 : f32 to vector<4x1xf32>
    %cst_9 = arith.constant 0.000000e+00 : f32
    %15 = vector.broadcast %cst_9 : f32 to vector<4x1xf32>
    %cst_10 = arith.constant 0.000000e+00 : f32
    %16 = vector.broadcast %cst_10 : f32 to vector<4x1xf32>
    %c0_11 = arith.constant 0 : index
    %c0_12 = arith.constant 0 : index
    %17 = vector.load %arg1[%c0_11, %c0_12] : memref<4x64xf32, #tpu.memory_space<vmem>>, vector<4x64xf32>
    %c0_13 = arith.constant 0 : index
    %c0_14 = arith.constant 0 : index
    %18 = vector.load %arg2[%c0_13, %c0_14] : memref<4x64xf32, #tpu.memory_space<vmem>>, vector<4x64xf32>
    %19 = vector.broadcast %11 : vector<4x1xf32> to vector<4x64xf32>
    %20 = arith.subf %17, %19 : vector<4x64xf32>
    %21 = vector.broadcast %13 : vector<4x1xf32> to vector<4x64xf32>
    %22 = arith.subf %18, %21 : vector<4x64xf32>
    %23 = arith.mulf %20, %22 : vector<4x64xf32>
    %cst_15 = arith.constant dense<0.000000e+00> : vector<4xf32>
    %24 = vector.multi_reduction <add>, %23, %cst_15 [1] : vector<4x64xf32> to vector<4xf32>
    %25 = vector.shape_cast %24 : vector<4xf32> to vector<4x1xf32>
    %26 = arith.addf %14, %25 : vector<4x1xf32>
    %27 = arith.mulf %20, %20 : vector<4x64xf32>
    %cst_16 = arith.constant dense<0.000000e+00> : vector<4xf32>
    %28 = vector.multi_reduction <add>, %27, %cst_16 [1] : vector<4x64xf32> to vector<4xf32>
    %29 = vector.shape_cast %28 : vector<4xf32> to vector<4x1xf32>
    %30 = arith.addf %15, %29 : vector<4x1xf32>
    %31 = arith.mulf %22, %22 : vector<4x64xf32>
    %cst_17 = arith.constant dense<0.000000e+00> : vector<4xf32>
    %32 = vector.multi_reduction <add>, %31, %cst_17 [1] : vector<4x64xf32> to vector<4xf32>
    %33 = vector.shape_cast %32 : vector<4xf32> to vector<4x1xf32>
    %34 = arith.addf %16, %33 : vector<4x1xf32>
    %35 = arith.mulf %30, %34 : vector<4x1xf32>
    %36 = math.sqrt %35 : vector<4x1xf32>
    %37 = arith.divf %26, %36 : vector<4x1xf32>
    %cst_18 = arith.constant 0.000000e+00 : f32
    %38 = vector.broadcast %cst_18 : f32 to vector<4x1xf32>
    %39 = arith.subf %38, %37 : vector<4x1xf32>
    %c0_19 = arith.constant 0 : index
    %c0_20 = arith.constant 0 : index
    %40 = vector.load %arg3[%c0_19, %c0_20] : memref<4x1xf32, #tpu.memory_space<vmem>>, vector<4x1xf32>
    tpu.vector_store %arg3[%c0_19, %c0_20], %39 {strides = array<i32>} : memref<4x1xf32, #tpu.memory_space<vmem>>, vector<4x1xf32>,
    return
  }
  func.func @transform_0(%arg0: i32) -> (i32, i32) {
    %c0_i32 = arith.constant 0 : i32
    %c0_i32_0 = arith.constant 0 : i32
    return %arg0, %c0_i32 : i32, i32
  }
  func.func @transform_1(%arg0: i32) -> (i32, i32) {
    %c0_i32 = arith.constant 0 : i32
    %c0_i32_0 = arith.constant 0 : i32
    return %arg0, %c0_i32 : i32, i32
  }
  func.func @transform_2(%arg0: i32) -> (i32, i32) {
    %c0_i32 = arith.constant 0 : i32
    %c0_i32_0 = arith.constant 0 : i32
    return %arg0, %c0_i32 : i32, i32
  }
}

</mosaic_0001>

<bundles_post_ra>
// kernel: tpu_custom_call.1
= control target key start
LH: loop header
LB: loop body
LE: loop exit
PB: predicated region body
PF: predicated region fallthrough
CT: control target
= control target key end

     0   :  { %7 = vsyncpa [#allocation3], 0  ;;  %s165_s0 = inlined_call_operand.hbm [shape: f32[4,64], index: 0, kind: input, shape index: {}]   ;;  %s166_s1 = inlined_call_operand.hbm [shape: f32[4,64], index: 1, kind: input, shape index: {}]   ;;  %s167_s2 = inlined_call_operand.vmem [shape: f32[4,1], index: 2, kind: output, shape index: {}]  }
   0x1   :  { %8 = vsyncpa [#allocation5], 0  ;;  %s134_s9 = smov [#allocation2]   ;;  %s135_s11 = smov [#allocation4]  }
   0x2   :  { %s15_s10 = sshll.u32 %s134_s9, 4  ;;  %s25_s12 = sshll.u32 %s135_s11, 4  ;;  %s16_s10 = int_to_ptr.vmem [resolvable:$true] %s15_s10  ;;  %s26_s12 = int_to_ptr.vmem [resolvable:$true] %s25_s12 }
   0x3   :  { %s98_s13 = scalar_lea.vmem %s16_s10, 64  ;;  %p103_p1 = scmp.lt.s32.totalorder %s16_s10, %s16_s10 }
   0x4   :  { %p99_p0 = scmp.ne.s32.totalorder %s16_s10, %s98_s13  ;;  %p104_p2 = scmp.lt.s32.totalorder %s98_s13, %s98_s13 }
   0x6   :  { %p105_p3 = por %p104_p2, %p103_p1 }
   0x8   :  { %p106_p4 = pnand %p105_p3, %p99_p0 }
   0xa   :  { %109 = shalt.err (!%p106_p4)
}
   0xb   :  { %18 = dma.hbm_to_vmem [thread:$0]  %s165_s0, 64, %s16_s10, [#allocation3]  }
   0xc   :  { %s118_s16 = scalar_lea.vmem %s26_s12, 64  ;;  %p123_p6 = scmp.lt.s32.totalorder %s26_s12, %s26_s12 }
   0xd   :  { %p119_p5 = scmp.ne.s32.totalorder %s26_s12, %s118_s16  ;;  %p124_p7 = scmp.lt.s32.totalorder %s118_s16, %s118_s16 }
   0xf   :  { %p125_p8 = por %p124_p7, %p123_p6 }
  0x11   :  { %p126_p9 = pnand %p125_p8, %p119_p5 }
  0x13   :  { %129 = shalt.err (!%p126_p9)
}
  0x14   :  { %28 = dma.hbm_to_vmem [thread:$0]  %s166_s1, 64, %s26_s12, [#allocation5]  }
  0x15   :  { %130 = dma.done.wait [#allocation3], 64  }
  0x16   :  { %131 = vsyncadd [#allocation3], 4294967232 }
  0x17   :  { %132 = dma.done.wait [#allocation5], 64  }
  0x18   :  { %133 = vsyncadd [#allocation5], 4294967232  ;;  %vm37_vm0 = vcmask 519168   ;;  %v35_v0 = vld [vmem:[#allocation2] sm:$0xf]  ;;  %vm76_vm3 = vcmask 3072  }
  0x19   :  { %v36_v1 = vld [vmem:[#allocation4] sm:$0xf]  ;;  %v38_v2 = vsel %vm37_vm0, %v35_v0, 0.0 }
  0x1a   :  { %39 = vadd.xlane.f32.xlu0 %v38_v2  ;;  %v42_v3 = vsel %vm37_vm0, %v36_v1, 0.0 }
  0x1e   :  { %43 = vadd.xlane.f32.xlu0 %v42_v3 }
  0xa3   :  { %v40_v4 = vpop.xlane.xlu0 %39 }
  0xa4   :  { %v46_v5 = vmul.f32 0.015625, %v40_v4 }
  0xa6   :  { %v48_v6 = vsub.f32 %v35_v0, %v46_v5 }
  0xa7   :  { %v44_v7 = vpop.xlane.xlu0 %43 }
  0xa8   :  { %v47_v8 = vmul.f32 0.015625, %v44_v7  ;;  %v55_v9 = vmul.f32 %v48_v6, %v48_v6 }
  0xaa   :  { %v49_v10 = vsub.f32 %v36_v1, %v47_v8  ;;  %v56_v11 = vsel %vm37_vm0, %v55_v9, 0.0 }
  0xab   :  { %57 = vadd.xlane.f32.xlu1 %v56_v11 }
  0xac   :  { %v60_v12 = vmul.f32 %v49_v10, %v49_v10  ;;  %v50_v13 = vmul.f32 %v49_v10, %v48_v6 }
  0xae   :  { %v61_v14 = vsel %vm37_vm0, %v60_v12, 0.0  ;;  %v51_v15 = vsel %vm37_vm0, %v50_v13, 0.0 }
  0xaf   :  { %62 = vadd.xlane.f32.xlu1 %v61_v14  ;;  %52 = vadd.xlane.f32.xlu0 %v51_v15 }
 0x134   :  { %v58_v16 = vpop.xlane.xlu1 %57 }
 0x138   :  { %v63_v17 = vpop.xlane.xlu1 %62  ;;  %v53_v25 = vpop.xlane.xlu0 %52 }
 0x139   :  { %v65_v18 = vmul.f32 %v63_v17, %v58_v16 }
 0x13b   :  { %86 = vrsqrt.f32 %v65_v18  ;;  %vm68_vm1 = vcmp.eq.f32.partialorder %v65_v18, inf  ;;  %v71_v21 = vand.u32 2147483648, %v65_v18  ;;  %vm70_vm2 = vcmp.eq.f32.partialorder %v65_v18, 0.0 }
 0x148   :  { %v87_v19 = vpop.eup %86 }
 0x149   :  { %v67_v20 = vmul.f32 %v87_v19, %v65_v18 }
 0x14b   :  { %v69_v22 = vsel %vm68_vm1, %v65_v18, %v67_v20 }
 0x14c   :  { %v72_v23 = vsel %vm70_vm2, %v71_v21, %v69_v22 }
 0x14d   :  { %88 = vrcp.f32 %v72_v23 }
 0x15a   :  { %v89_v24 = vpop.eup %88 }
 0x15b   :  { %v74_v26 = vmul.f32 %v89_v24, %v53_v25 }
 0x15d   :  { %v75_v27 = vsub.f32 0.0, %v74_v26 }
 0x15f   :  { %77 = vst.msk [vmem:[%s167_s2] sm:$0xf] %vm76_vm3, %v75_v27 }
 0x160   :  { %82 = vsyncpa [#allocation3], 1 }
 0x161   :  { %83 = vsyncpa [#allocation5], 1 }

</bundles_post_ra>
